<compile_context>
chip_gen: v7x
topology: tpu7x:2x2x1
jax: 0.10.0
libtpu: 0.0.40
codegen_flags: <defaults>
</compile_context>

<pallas_src>
import math

import jax
import jax.numpy as jnp
from jax.experimental import pallas as pl
from jax.experimental.pallas import tpu as pltpu


def _round_up(x: int, m: int) -> int:
    return ((x + m - 1) // m) * m


def _pad2d(x, rows: int, cols: int):
    r, c = x.shape
    if r == rows and c == cols:
        return x
    return jnp.pad(x, ((0, rows - r), (0, cols - c)))


def make_fused_kernel(rf_scale: float, ln_eps: float, inv_h: float):
    def kernel(hs_ref, inp_ref,
               wd_ref, bd_ref,
               wdown_ref, bdown_ref,
               omega_ref,
               wup_ref, bup_ref,
               gamma_ref, beta_ref,
               out_ref):
        # dense: intermediate -> hidden (bf16 operands, f32 accumulate on MXU)
        h = jnp.dot(hs_ref[...], wd_ref[...],
                    preferred_element_type=jnp.float32) + bd_ref[...]
        # dropout: identity (eval mode)

        # adapter down-projection
        z = jnp.dot(h.astype(jnp.bfloat16), wdown_ref[...],
                    preferred_element_type=jnp.float32) + bdown_ref[...]
        # ReLU random features
        phi = jnp.maximum(
            jnp.dot(z.astype(jnp.bfloat16), omega_ref[...],
                    preferred_element_type=jnp.float32),
            0.0) * rf_scale
        # adapter up-projection + adapter residual
        up = jnp.dot(phi.astype(jnp.bfloat16), wup_ref[...],
                     preferred_element_type=jnp.float32) + bup_ref[...]
        a = h + up

        # residual + LayerNorm over the TRUE hidden axis, all in f32.
        # Padded hidden lanes are exactly zero (zero-padded weights/biases/inputs),
        # so plain sums divided by the true H and E[x^2]-mean^2 are exact on the
        # real columns; padded output lanes are sliced off in the wrapper.
        x = a + inp_ref[...]
        mean = jnp.sum(x, axis=-1, keepdims=True) * inv_h
        ex2 = jnp.sum(x * x, axis=-1, keepdims=True) * inv_h
        var = jnp.maximum(ex2 - mean * mean, 0.0)
        scale = gamma_ref[...] * jax.lax.rsqrt(var + ln_eps)     # [tile_m, H_p]
        shift = beta_ref[...] - mean * scale                     # fold mean in
        out_ref[...] = (x * scale + shift).astype(out_ref.dtype)

    return kernel


def relu_adapter_bert_output(hidden_states, input_tensor, params, *,
                             num_rfs, normalization_constant, layer_norm_eps,
                             tile_m=256, single_buffer_weights=False):
    """hidden_states: [M, I], input_tensor: [M, H] -> [M, H] f32."""
    M, I = hidden_states.shape
    H = input_tensor.shape[-1]
    D = params["w_down"].shape[-1]
    R = params["omega"].shape[-1]

    LANE = 128
    I_p = _round_up(I, LANE)
    H_p = _round_up(H, LANE)
    D_p = _round_up(D, LANE)
    R_p = _round_up(R, LANE)

    # MXU-aligned row tile; clamp so tiny test shapes don't pad M absurdly.
    tile_m = max(8, min(int(tile_m), _round_up(M, 8)))
    M_p = _round_up(M, tile_m)
    grid = (M_p // tile_m,)

    rf_scale = float(normalization_constant) / math.sqrt(float(num_rfs))
    kernel = make_fused_kernel(rf_scale, float(layer_norm_eps), 1.0 / float(H))

    # bf16 for everything the MXU touches; f32 for biases / LN affine (added to
    # f32 accumulators). Zero-padding keeps all the math exact on real columns.
    hs = _pad2d(hidden_states.astype(jnp.bfloat16), M_p, I_p)
    inp = _pad2d(input_tensor.astype(jnp.float32), M_p, H_p)

    w_dense = _pad2d(params["w_dense"].astype(jnp.bfloat16), I_p, H_p)
    w_down = _pad2d(params["w_down"].astype(jnp.bfloat16), H_p, D_p)
    omega = _pad2d(params["omega"].astype(jnp.bfloat16), D_p, R_p)
    w_up = _pad2d(params["w_up"].astype(jnp.bfloat16), R_p, H_p)

    b_dense = _pad2d(params["b_dense"].astype(jnp.float32).reshape(1, H), 1, H_p)
    b_down = _pad2d(params["b_down"].astype(jnp.float32).reshape(1, D), 1, D_p)
    b_up = _pad2d(params["b_up"].astype(jnp.float32).reshape(1, H), 1, H_p)
    gamma = _pad2d(params["ln_gamma"].astype(jnp.float32).reshape(1, H), 1, H_p)
    beta = _pad2d(params["ln_beta"].astype(jnp.float32).reshape(1, H), 1, H_p)

    def row_spec(cols):
        return pl.BlockSpec((tile_m, cols), lambda i: (i, 0))

    def resident_spec(shape):
        # Constant index_map -> the block stays VMEM-resident across the grid.
        if single_buffer_weights:
            # v7x (64 MiB VMEM): don't double-buffer never-changing weights.
            return pl.BlockSpec(shape, lambda i: (0,) * len(shape),
                                pipeline_mode=pl.Buffered(1))
        return pl.BlockSpec(shape, lambda i: (0,) * len(shape))

    # Explicit VMEM budget: 2x (resident weights + small vecs) for default
    # double-buffering, 2x the streamed activation tiles, intermediates, headroom.
    BF16, F32 = 2, 4
    weight_bytes = (I_p * H_p + H_p * D_p + D_p * R_p + R_p * H_p) * BF16
    small_bytes = (4 * H_p + D_p) * F32
    act_bytes = tile_m * (I_p * BF16 + 2 * H_p * F32)        # hs + inp + out tiles
    interm_bytes = tile_m * (4 * H_p + D_p + R_p) * F32      # h, up, x, scale, z, phi
    est = 2 * (weight_bytes + small_bytes) + 2 * act_bytes + interm_bytes + (8 << 20)
    vmem_limit_bytes = int(min(max(est, 32 << 20), 64 << 20))

    out_padded = pl.pallas_call(
        kernel,
        out_shape=jax.ShapeDtypeStruct((M_p, H_p), jnp.float32),
        grid_spec=pltpu.PrefetchScalarGridSpec(
            num_scalar_prefetch=0,
            grid=grid,
            in_specs=[
                row_spec(I_p),               # hidden_states tile     [tile_m, I_p]
                row_spec(H_p),               # input_tensor tile      [tile_m, H_p]
                resident_spec((I_p, H_p)),   # W_dense
                resident_spec((1, H_p)),     # b_dense
                resident_spec((H_p, D_p)),   # W_down
                resident_spec((1, D_p)),     # b_down
                resident_spec((D_p, R_p)),   # Omega (random features)
                resident_spec((R_p, H_p)),   # W_up
                resident_spec((1, H_p)),     # b_up
                resident_spec((1, H_p)),     # LN gamma
                resident_spec((1, H_p)),     # LN beta
            ],
            out_specs=row_spec(H_p),
        ),
        compiler_params=pltpu.CompilerParams(
            dimension_semantics=("parallel",),
            vmem_limit_bytes=vmem_limit_bytes),
    )(hs, inp,
      w_dense, b_dense,
      w_down, b_down,
      omega,
      w_up, b_up,
      gamma, beta)

    return out_padded[:M, :H]


def reference(hidden_states, input_tensor, params, *, num_rfs,
              normalization_constant, layer_norm_eps, cast_bf16=True):
    """Pure-JAX reference; mirrors the kernel's bf16-operand / f32-accumulate precision."""
    cast = (lambda a: a.astype(jnp.bfloat16)) if cast_bf16 else (lambda a: a)
    h = jnp.dot(cast(hidden_states), cast(params["w_dense"]),
                preferred_element_type=jnp.float32) + params["b_dense"]
    z = jnp.dot(cast(h), cast(params["w_down"]),
                preferred_element_type=jnp.float32) + params["b_down"]
    phi = jnp.maximum(
        jnp.dot(cast(z), cast(params["omega"]),
                preferred_element_type=jnp.float32), 0.0) * (
        normalization_constant / math.sqrt(num_rfs))
    up = jnp.dot(cast(phi), cast(params["w_up"]),
                 preferred_element_type=jnp.float32) + params["b_up"]
    x = h + up + input_tensor
    mean = jnp.mean(x, axis=-1, keepdims=True)
    var = jnp.mean((x - mean) ** 2, axis=-1, keepdims=True)
    return (x - mean) / jnp.sqrt(var + layer_norm_eps) * params["ln_gamma"] \
        + params["ln_beta"]


if __name__ == "__main__":
    # Small config consistent with the module's shapes.
    batch, seq = 2, 8
    intermediate_size = 64
    hidden_size = 32
    down_sample = 8
    num_rfs = 16
    normalization_constant = 1.0
    layer_norm_eps = 1e-12

    M = batch * seq
    key = jax.random.PRNGKey(0)
    ks = jax.random.split(key, 8)

    hidden_states = jax.random.normal(ks[0], (M, intermediate_size), jnp.float32)
    input_tensor = jax.random.normal(ks[1], (M, hidden_size), jnp.float32)

    params = {
        "w_dense": jax.random.normal(ks[2], (intermediate_size, hidden_size),
                                     jnp.float32) * 0.05,
        "b_dense": jnp.zeros((hidden_size,), jnp.float32),
        "w_down": jax.random.normal(ks[3], (hidden_size, down_sample),
                                    jnp.float32) * 0.05,
        "b_down": jnp.zeros((down_sample,), jnp.float32),
        "omega": jax.random.normal(ks[4], (down_sample, num_rfs), jnp.float32),
        "w_up": jax.random.normal(ks[5], (num_rfs, hidden_size),
                                  jnp.float32) * 0.05,
        "b_up": jnp.zeros((hidden_size,), jnp.float32),
        "ln_gamma": jnp.ones((hidden_size,), jnp.float32),
        "ln_beta": jnp.zeros((hidden_size,), jnp.float32),
    }

    out = relu_adapter_bert_output(
        hidden_states, input_tensor, params,
        num_rfs=num_rfs, normalization_constant=normalization_constant,
        layer_norm_eps=layer_norm_eps, tile_m=256)
    out = jax.block_until_ready(out)

    ref = reference(hidden_states, input_tensor, params,
                    num_rfs=num_rfs,
                    normalization_constant=normalization_constant,
                    layer_norm_eps=layer_norm_eps, cast_bf16=True)
    assert out.shape == (M, hidden_size)
    assert jnp.allclose(out, ref, atol=1e-2, rtol=1e-2), (
        "mismatch vs reference, max abs diff = %g"
        % float(jnp.max(jnp.abs(out - ref))))
    print("KERNEL_OK")
</pallas_src>

<mosaic_0001>
module attributes {stable_mosaic.version = 11 : i64} {
  func.func @kernel(%arg0: i32, %arg1: memref<16x128xbf16, #tpu.memory_space<vmem>>, %arg2: memref<16x128xf32, #tpu.memory_space<vmem>>, %arg3: memref<128x128xbf16, #tpu.memory_space<vmem>>, %arg4: memref<1x128xf32, #tpu.memory_space<vmem>>, %arg5: memref<128x128xbf16, #tpu.memory_space<vmem>>, %arg6: memref<1x128xf32, #tpu.memory_space<vmem>>, %arg7: memref<128x128xbf16, #tpu.memory_space<vmem>>, %arg8: memref<128x128xbf16, #tpu.memory_space<vmem>>, %arg9: memref<1x128xf32, #tpu.memory_space<vmem>>, %arg10: memref<1x128xf32, #tpu.memory_space<vmem>>, %arg11: memref<1x128xf32, #tpu.memory_space<vmem>>, %arg12: memref<16x128xf32, #tpu.memory_space<vmem>>) attributes {dimension_semantics = [#tpu.dimension_semantics<parallel>], iteration_bounds = array<i64: 1>, scalar_prefetch = 0 : i64, scratch_operands = 0 : i64, tpu.core_type = #tpu.core_type<tc>, window_params = [{transform_indices = @transform_0, window_bounds = array<i64: 16, 128>}, {transform_indices = @transform_1, window_bounds = array<i64: 16, 128>}, {pipeline_mode = #tpu.pipeline_mode<synchronous>, transform_indices = @transform_2, window_bounds = array<i64: 128, 128>}, {pipeline_mode = #tpu.pipeline_mode<synchronous>, transform_indices = @transform_3, window_bounds = array<i64: 1, 128>}, {pipeline_mode = #tpu.pipeline_mode<synchronous>, transform_indices = @transform_4, window_bounds = array<i64: 128, 128>}, {pipeline_mode = #tpu.pipeline_mode<synchronous>, transform_indices = @transform_5, window_bounds = array<i64: 1, 128>}, {pipeline_mode = #tpu.pipeline_mode<synchronous>, transform_indices = @transform_6, window_bounds = array<i64: 128, 128>}, {pipeline_mode = #tpu.pipeline_mode<synchronous>, transform_indices = @transform_7, window_bounds = array<i64: 128, 128>}, {pipeline_mode = #tpu.pipeline_mode<synchronous>, transform_indices = @transform_8, window_bounds = array<i64: 1, 128>}, {pipeline_mode = #tpu.pipeline_mode<synchronous>, transform_indices = @transform_9, window_bounds = array<i64: 1, 128>}, {pipeline_mode = #tpu.pipeline_mode<synchronous>, transform_indices = @transform_10, window_bounds = array<i64: 1, 128>}, {transform_indices = @transform_11, window_bounds = array<i64: 16, 128>}]} {
    %c0 = arith.constant 0 : index
    %c0_0 = arith.constant 0 : index
    %0 = vector.load %arg1[%c0, %c0_0] : memref<16x128xbf16, #tpu.memory_space<vmem>>, vector<16x128xbf16>
    %c0_1 = arith.constant 0 : index
    %c0_2 = arith.constant 0 : index
    %1 = vector.load %arg3[%c0_1, %c0_2] : memref<128x128xbf16, #tpu.memory_space<vmem>>, vector<128x128xbf16>
    %cst = arith.constant dense<0.000000e+00> : vector<16x128xf32>
    %2 = tpu.matmul %0, %1, %cst {dimension_numbers = #tpu.dot_dimension_numbers<[1], [0], [0], [1], [0, 0, 1, 1], [], []>} : vector<16x128xbf16>, vector<128x128xbf16>, vector<16x128xf32> -> vector<16x128xf32>
    %c0_3 = arith.constant 0 : index
    %c0_4 = arith.constant 0 : index
    %3 = vector.load %arg4[%c0_3, %c0_4] : memref<1x128xf32, #tpu.memory_space<vmem>>, vector<1x128xf32>
    %4 = vector.broadcast %3 : vector<1x128xf32> to vector<16x128xf32>
    %5 = arith.addf %2, %4 : vector<16x128xf32>
    %6 = arith.truncf %5 : vector<16x128xf32> to vector<16x128xbf16>
    %c0_5 = arith.constant 0 : index
    %c0_6 = arith.constant 0 : index
    %7 = vector.load %arg5[%c0_5, %c0_6] : memref<128x128xbf16, #tpu.memory_space<vmem>>, vector<128x128xbf16>
    %cst_7 = arith.constant dense<0.000000e+00> : vector<16x128xf32>
    %8 = tpu.matmul %6, %7, %cst_7 {dimension_numbers = #tpu.dot_dimension_numbers<[1], [0], [0], [1], [0, 0, 1, 1], [], []>} : vector<16x128xbf16>, vector<128x128xbf16>, vector<16x128xf32> -> vector<16x128xf32>
    %c0_8 = arith.constant 0 : index
    %c0_9 = arith.constant 0 : index
    %9 = vector.load %arg6[%c0_8, %c0_9] : memref<1x128xf32, #tpu.memory_space<vmem>>, vector<1x128xf32>
    %10 = vector.broadcast %9 : vector<1x128xf32> to vector<16x128xf32>
    %11 = arith.addf %8, %10 : vector<16x128xf32>
    %12 = arith.truncf %11 : vector<16x128xf32> to vector<16x128xbf16>
    %c0_10 = arith.constant 0 : index
    %c0_11 = arith.constant 0 : index
    %13 = vector.load %arg7[%c0_10, %c0_11] : memref<128x128xbf16, #tpu.memory_space<vmem>>, vector<128x128xbf16>
    %cst_12 = arith.constant dense<0.000000e+00> : vector<16x128xf32>
    %14 = tpu.matmul %12, %13, %cst_12 {dimension_numbers = #tpu.dot_dimension_numbers<[1], [0], [0], [1], [0, 0, 1, 1], [], []>} : vector<16x128xbf16>, vector<128x128xbf16>, vector<16x128xf32> -> vector<16x128xf32>
    %cst_13 = arith.constant 0.000000e+00 : f32
    %15 = vector.broadcast %cst_13 : f32 to vector<16x128xf32>
    %16 = arith.maximumf %14, %15 : vector<16x128xf32>
    %cst_14 = arith.constant 2.500000e-01 : f32
    %17 = vector.broadcast %cst_14 : f32 to vector<16x128xf32>
    %18 = arith.mulf %16, %17 : vector<16x128xf32>
    %19 = arith.truncf %18 : vector<16x128xf32> to vector<16x128xbf16>
    %c0_15 = arith.constant 0 : index
    %c0_16 = arith.constant 0 : index
    %20 = vector.load %arg8[%c0_15, %c0_16] : memref<128x128xbf16, #tpu.memory_space<vmem>>, vector<128x128xbf16>
    %cst_17 = arith.constant dense<0.000000e+00> : vector<16x128xf32>
    %21 = tpu.matmul %19, %20, %cst_17 {dimension_numbers = #tpu.dot_dimension_numbers<[1], [0], [0], [1], [0, 0, 1, 1], [], []>} : vector<16x128xbf16>, vector<128x128xbf16>, vector<16x128xf32> -> vector<16x128xf32>
    %c0_18 = arith.constant 0 : index
    %c0_19 = arith.constant 0 : index
    %22 = vector.load %arg9[%c0_18, %c0_19] : memref<1x128xf32, #tpu.memory_space<vmem>>, vector<1x128xf32>
    %23 = vector.broadcast %22 : vector<1x128xf32> to vector<16x128xf32>
    %24 = arith.addf %21, %23 : vector<16x128xf32>
    %25 = arith.addf %5, %24 : vector<16x128xf32>
    %c0_20 = arith.constant 0 : index
    %c0_21 = arith.constant 0 : index
    %26 = vector.load %arg2[%c0_20, %c0_21] : memref<16x128xf32, #tpu.memory_space<vmem>>, vector<16x128xf32>
    %27 = arith.addf %25, %26 : vector<16x128xf32>
    %cst_22 = arith.constant dense<0.000000e+00> : vector<16xf32>
    %28 = vector.multi_reduction <add>, %27, %cst_22 [1] : vector<16x128xf32> to vector<16xf32>
    %29 = vector.shape_cast %28 : vector<16xf32> to vector<16x1xf32>
    %cst_23 = arith.constant 3.125000e-02 : f32
    %30 = vector.broadcast %cst_23 : f32 to vector<16x1xf32>
    %31 = arith.mulf %29, %30 : vector<16x1xf32>
    %32 = arith.mulf %27, %27 : vector<16x128xf32>
    %cst_24 = arith.constant dense<0.000000e+00> : vector<16xf32>
    %33 = vector.multi_reduction <add>, %32, %cst_24 [1] : vector<16x128xf32> to vector<16xf32>
    %34 = vector.shape_cast %33 : vector<16xf32> to vector<16x1xf32>
    %cst_25 = arith.constant 3.125000e-02 : f32
    %35 = vector.broadcast %cst_25 : f32 to vector<16x1xf32>
    %36 = arith.mulf %34, %35 : vector<16x1xf32>
    %37 = arith.mulf %31, %31 : vector<16x1xf32>
    %38 = arith.subf %36, %37 : vector<16x1xf32>
    %cst_26 = arith.constant 0.000000e+00 : f32
    %39 = vector.broadcast %cst_26 : f32 to vector<16x1xf32>
    %40 = arith.maximumf %38, %39 : vector<16x1xf32>
    %c0_27 = arith.constant 0 : index
    %c0_28 = arith.constant 0 : index
    %41 = vector.load %arg10[%c0_27, %c0_28] : memref<1x128xf32, #tpu.memory_space<vmem>>, vector<1x128xf32>
    %cst_29 = arith.constant 9.99999996E-13 : f32
    %42 = vector.broadcast %cst_29 : f32 to vector<16x1xf32>
    %43 = arith.addf %40, %42 : vector<16x1xf32>
    %44 = math.rsqrt %43 : vector<16x1xf32>
    %45 = vector.broadcast %41 : vector<1x128xf32> to vector<16x128xf32>
    %46 = vector.broadcast %44 : vector<16x1xf32> to vector<16x128xf32>
    %47 = arith.mulf %45, %46 : vector<16x128xf32>
    %c0_30 = arith.constant 0 : index
    %c0_31 = arith.constant 0 : index
    %48 = vector.load %arg11[%c0_30, %c0_31] : memref<1x128xf32, #tpu.memory_space<vmem>>, vector<1x128xf32>
    %49 = vector.broadcast %31 : vector<16x1xf32> to vector<16x128xf32>
    %50 = arith.mulf %49, %47 : vector<16x128xf32>
    %51 = vector.broadcast %48 : vector<1x128xf32> to vector<16x128xf32>
    %52 = arith.subf %51, %50 : vector<16x128xf32>
    %53 = arith.mulf %27, %47 : vector<16x128xf32>
    %54 = arith.addf %53, %52 : vector<16x128xf32>
    %c0_32 = arith.constant 0 : index
    %c0_33 = arith.constant 0 : index
    %55 = vector.load %arg12[%c0_32, %c0_33] : memref<16x128xf32, #tpu.memory_space<vmem>>, vector<16x128xf32>
    tpu.vector_store %arg12[%c0_32, %c0_33], %54 {strides = array<i32>} : memref<16x128xf32, #tpu.memory_space<vmem>>, vector<16x128xf32>,
    return
  }
  func.func @transform_0(%arg0: i32) -> (i32, i32) {
    %c0_i32 = arith.constant 0 : i32
    %c0_i32_0 = arith.constant 0 : i32
    return %arg0, %c0_i32 : i32, i32
  }
  func.func @transform_1(%arg0: i32) -> (i32, i32) {
    %c0_i32 = arith.constant 0 : i32
    %c0_i32_0 = arith.constant 0 : i32
    return %arg0, %c0_i32 : i32, i32
  }
  func.func @transform_2(%arg0: i32) -> (i32, i32) {
    %c0_i32 = arith.constant 0 : i32
    %c0_i32_0 = arith.constant 0 : i32
    %c0_i32_1 = arith.constant 0 : i32
    return %c0_i32, %c0_i32_0 : i32, i32
  }
  func.func @transform_3(%arg0: i32) -> (i32, i32) {
    %c0_i32 = arith.constant 0 : i32
    %c0_i32_0 = arith.constant 0 : i32
    %c0_i32_1 = arith.constant 0 : i32
    return %c0_i32, %c0_i32_0 : i32, i32
  }
  func.func @transform_4(%arg0: i32) -> (i32, i32) {
    %c0_i32 = arith.constant 0 : i32
    %c0_i32_0 = arith.constant 0 : i32
    %c0_i32_1 = arith.constant 0 : i32
    return %c0_i32, %c0_i32_0 : i32, i32
  }
  func.func @transform_5(%arg0: i32) -> (i32, i32) {
    %c0_i32 = arith.constant 0 : i32
    %c0_i32_0 = arith.constant 0 : i32
    %c0_i32_1 = arith.constant 0 : i32
    return %c0_i32, %c0_i32_0 : i32, i32
  }
  func.func @transform_6(%arg0: i32) -> (i32, i32) {
    %c0_i32 = arith.constant 0 : i32
    %c0_i32_0 = arith.constant 0 : i32
    %c0_i32_1 = arith.constant 0 : i32
    return %c0_i32, %c0_i32_0 : i32, i32
  }
  func.func @transform_7(%arg0: i32) -> (i32, i32) {
    %c0_i32 = arith.constant 0 : i32
    %c0_i32_0 = arith.constant 0 : i32
    %c0_i32_1 = arith.constant 0 : i32
    return %c0_i32, %c0_i32_0 : i32, i32
  }
  func.func @transform_8(%arg0: i32) -> (i32, i32) {
    %c0_i32 = arith.constant 0 : i32
    %c0_i32_0 = arith.constant 0 : i32
    %c0_i32_1 = arith.constant 0 : i32
    return %c0_i32, %c0_i32_0 : i32, i32
  }
  func.func @transform_9(%arg0: i32) -> (i32, i32) {
    %c0_i32 = arith.constant 0 : i32
    %c0_i32_0 = arith.constant 0 : i32
    %c0_i32_1 = arith.constant 0 : i32
    return %c0_i32, %c0_i32_0 : i32, i32
  }
  func.func @transform_10(%arg0: i32) -> (i32, i32) {
    %c0_i32 = arith.constant 0 : i32
    %c0_i32_0 = arith.constant 0 : i32
    %c0_i32_1 = arith.constant 0 : i32
    return %c0_i32, %c0_i32_0 : i32, i32
  }
  func.func @transform_11(%arg0: i32) -> (i32, i32) {
    %c0_i32 = arith.constant 0 : i32
    %c0_i32_0 = arith.constant 0 : i32
    return %arg0, %c0_i32 : i32, i32
  }
}

</mosaic_0001>

<bundles_post_ra>
// kernel: tpu_custom_call.1
= control target key start
LH: loop header
LB: loop body
LE: loop exit
PB: predicated region body
PF: predicated region fallthrough
CT: control target
= control target key end

     0   :  { %16 = vsyncpa [#allocation3], 0  ;;  %s1255_s0 = inlined_call_operand.hbm [shape: bf16[16,128], index: 0, kind: input, shape index: {}]   ;;  %s1256_s1 = inlined_call_operand.hbm [shape: f32[16,128], index: 1, kind: input, shape index: {}]   ;;  %s1257_s2 = inlined_call_operand.hbm [shape: bf16[128,128], index: 2, kind: input, shape index: {}]   ;;  %s1258_s3 = inlined_call_operand.vmem [shape: f32[1,128], index: 3, kind: input, shape index: {}]   ;;  %s1259_s4 = inlined_call_operand.hbm [shape: bf16[128,128], index: 4, kind: input, shape index: {}]   ;;  %s1260_s5 = inlined_call_operand.vmem [shape: f32[1,128], index: 5, kind: input, shape index: {}]   ;;  %s1261_s6 = inlined_call_operand.hbm [shape: bf16[128,128], index: 6, kind: input, shape index: {}]   ;;  %s1262_s7 = inlined_call_operand.hbm [shape: bf16[128,128], index: 7, kind: input, shape index: {}]   ;;  %s1263_s8 = inlined_call_operand.vmem [shape: f32[1,128], index: 8, kind: input, shape index: {}]   ;;  %s1264_s9 = inlined_call_operand.vmem [shape: f32[1,128], index: 9, kind: input, shape index: {}]   ;;  %s1265_s10 = inlined_call_operand.vmem [shape: f32[1,128], index: 10, kind: input, shape index: {}]   ;;  %s1266_s11 = inlined_call_operand.hbm [shape: f32[16,128], index: 11, kind: output, shape index: {}]  }
   0x1   :  { %17 = vsyncpa [#allocation6], 0 }
   0x2   :  { %18 = vsyncpa [#allocation9], 0 }
   0x3   :  { %19 = vsyncpa [#allocation12], 0 }
   0x4   :  { %20 = vsyncpa [#allocation4], 0  ;;  %s1022_s17 = smov [#allocation5]   ;;  %s858_s21 = scalar_lea.hbm %s1256_s1, 256 }
   0x5   :  { %s38_s18 = sshll.u32 %s1022_s17, 4  ;;  %p859_p0 = scmp.ne.s32.totalorder %s1256_s1, %s858_s21  ;;  %s39_s18 = int_to_ptr.vmem [resolvable:$true] %s38_s18 }
   0x6   :  { %p862_p1 = scmp.lt.u32.totalorder %s858_s21, %s1256_s1 }
   0x8   :  { %p864_p2 = pnand %p862_p1, %p859_p0 }
   0xa   :  { %867 = shalt.err (!%p864_p2)
}
   0xb   :  { %s868_s26 = scalar_lea.vmem %s39_s18, 256  ;;  %p873_p4 = scmp.lt.s32.totalorder %s39_s18, %s39_s18 }
   0xc   :  { %p869_p3 = scmp.ne.s32.totalorder %s39_s18, %s868_s26  ;;  %p874_p5 = scmp.lt.s32.totalorder %s868_s26, %s868_s26 }
   0xe   :  { %p875_p6 = por %p874_p5, %p873_p4 }
  0x10   :  { %p876_p7 = pnand %p875_p6, %p869_p3 }
  0x12   :  { %879 = shalt.err (!%p876_p7)
}
  0x13   :  { %s1023_s27 = smov 128   ;;  %s1024_s28 = smov 8  }
  0x14   :  { %44 = dma.hbm_to_vmem [thread:$0]  %s1256_s1, 256, %s39_s18, [#allocation6], %s1023_s27, %s1023_s27, %s1024_s28  }
  0x15   :  { %s1025_s12 = smov [#allocation8]   ;;  %s1026_s14 = smov [#allocation2]  }
  0x16   :  { %s64_s13 = sshll.u32 %s1025_s12, 4  ;;  %s26_s15 = sshll.u32 %s1026_s14, 4  ;;  %s65_s13 = int_to_ptr.vmem [resolvable:$true] %s64_s13  ;;  %s27_s15 = int_to_ptr.vmem [resolvable:$true] %s26_s15 }
  0x17   :  { %s880_s19 = scalar_lea.hbm %s1259_s4, 1024 }
  0x18   :  { %p881_p8 = scmp.ne.s32.totalorder %s1259_s4, %s880_s19  ;;  %p884_p9 = scmp.lt.u32.totalorder %s880_s19, %s1259_s4 }
  0x1a   :  { %p886_p10 = pnand %p884_p9, %p881_p8 }
  0x1c   :  { %889 = shalt.err (!%p886_p10)
}
  0x1d   :  { %s890_s1 = scalar_lea.vmem %s65_s13, 1024  ;;  %p895_p12 = scmp.lt.s32.totalorder %s65_s13, %s65_s13 }
  0x1e   :  { %p891_p11 = scmp.ne.s32.totalorder %s65_s13, %s890_s1  ;;  %p896_p13 = scmp.lt.s32.totalorder %s890_s1, %s890_s1 }
  0x20   :  { %p897_p0 = por %p896_p13, %p895_p12 }
  0x22   :  { %p898_p1 = pnand %p897_p0, %p891_p11 }
  0x24   :  { %901 = shalt.err (!%p898_p1)
}
  0x25   :  { %s1027_s18 = smov 64   ;;  %s1028_s24 = smov 4  }
  0x26   :  { %70 = dma.hbm_to_vmem [thread:$0]  %s1259_s4, 1024, %s65_s13, [#allocation9], %s1027_s18, %s1027_s18, %s1028_s24  }
  0x27   :  { %s902_s12 = scalar_lea.hbm %s1255_s0, 128 }
  0x28   :  { %p903_p2 = scmp.ne.s32.totalorder %s1255_s0, %s902_s12  ;;  %p906_p3 = scmp.lt.u32.totalorder %s902_s12, %s1255_s0 }
  0x2a   :  { %p908_p4 = pnand %p906_p3, %p903_p2 }
  0x2c   :  { %911 = shalt.err (!%p908_p4)
}
  0x2d   :  { %s912_s20 = scalar_lea.vmem %s27_s15, 128  ;;  %p917_p6 = scmp.lt.s32.totalorder %s27_s15, %s27_s15 }
  0x2e   :  { %p913_p5 = scmp.ne.s32.totalorder %s27_s15, %s912_s20  ;;  %p918_p7 = scmp.lt.s32.totalorder %s912_s20, %s912_s20 }
  0x30   :  { %p919_p8 = por %p918_p7, %p917_p6 }
  0x32   :  { %p920_p9 = pnand %p919_p8, %p913_p5 }
  0x34   :  { %923 = shalt.err (!%p920_p9)
}
  0x35   :  { %32 = dma.hbm_to_vmem [thread:$0]  %s1255_s0, 128, %s27_s15, [#allocation3], %s1027_s18, %s1027_s18, %s1028_s24  }
  0x36   :  { %s1029_s21 = smov [#allocation7]   ;;  %s1030_s23 = smov [#allocation10]  }
  0x37   :  { %s50_s22 = sshll.u32 %s1029_s21, 4  ;;  %s78_s1 = sshll.u32 %s1030_s23, 4  ;;  %s51_s22 = int_to_ptr.vmem [resolvable:$true] %s50_s22  ;;  %s79_s1 = int_to_ptr.vmem [resolvable:$true] %s78_s1 }
  0x38   :  { %s924_s29 = scalar_lea.hbm %s1257_s2, 1024 }
  0x39   :  { %p925_p10 = scmp.ne.s32.totalorder %s1257_s2, %s924_s29  ;;  %p928_p11 = scmp.lt.u32.totalorder %s924_s29, %s1257_s2 }
  0x3b   :  { %p930_p12 = pnand %p928_p11, %p925_p10 }
  0x3d   :  { %933 = shalt.err (!%p930_p12)
}
  0x3e   :  { %s934_s0 = scalar_lea.vmem %s51_s22, 1024  ;;  %p939_p0 = scmp.lt.s32.totalorder %s51_s22, %s51_s22 }
  0x3f   :  { %p935_p13 = scmp.ne.s32.totalorder %s51_s22, %s934_s0  ;;  %p940_p1 = scmp.lt.s32.totalorder %s934_s0, %s934_s0 }
  0x41   :  { %p941_p2 = por %p940_p1, %p939_p0 }
  0x43   :  { %p942_p3 = pnand %p941_p2, %p935_p13 }
  0x45   :  { %945 = shalt.err (!%p942_p3)
}
  0x46   :  { %56 = dma.hbm_to_vmem [thread:$0]  %s1257_s2, 1024, %s51_s22, [#allocation6], %s1027_s18, %s1027_s18, %s1028_s24  }
  0x47   :  { %s946_s4 = scalar_lea.hbm %s1261_s6, 1024 }
  0x48   :  { %p947_p4 = scmp.ne.s32.totalorder %s1261_s6, %s946_s4  ;;  %p950_p5 = scmp.lt.u32.totalorder %s946_s4, %s1261_s6 }
  0x4a   :  { %p952_p6 = pnand %p950_p5, %p947_p4 }
  0x4c   :  { %955 = shalt.err (!%p952_p6)
}
  0x4d   :  { %s956_s26 = scalar_lea.vmem %s79_s1, 1024  ;;  %p961_p8 = scmp.lt.s32.totalorder %s79_s1, %s79_s1 }
  0x4e   :  { %p957_p7 = scmp.ne.s32.totalorder %s79_s1, %s956_s26  ;;  %p962_p9 = scmp.lt.s32.totalorder %s956_s26, %s956_s26 }
  0x50   :  { %p963_p10 = por %p962_p9, %p961_p8 }
  0x52   :  { %p964_p11 = pnand %p963_p10, %p957_p7 }
  0x54   :  { %967 = shalt.err (!%p964_p11)
}
  0x55   :  { %84 = dma.hbm_to_vmem [thread:$0]  %s1261_s6, 1024, %s79_s1, [#allocation9], %s1027_s18, %s1027_s18, %s1028_s24  }
  0x56   :  { %s1031_s29 = smov [#allocation11]   ;;  %s968_s16 = scalar_lea.hbm %s1262_s7, 1024 }
  0x57   :  { %s90_s30 = sshll.u32 %s1031_s29, 4  ;;  %p969_p12 = scmp.ne.s32.totalorder %s1262_s7, %s968_s16  ;;  %s91_s30 = int_to_ptr.vmem [resolvable:$true] %s90_s30 }
  0x58   :  { %p972_p13 = scmp.lt.u32.totalorder %s968_s16, %s1262_s7 }
  0x5a   :  { %p974_p0 = pnand %p972_p13, %p969_p12 }
  0x5c   :  { %977 = shalt.err (!%p974_p0)
}
  0x5d   :  { %s978_s20 = scalar_lea.vmem %s91_s30, 1024  ;;  %p983_p2 = scmp.lt.s32.totalorder %s91_s30, %s91_s30 }
  0x5e   :  { %p979_p1 = scmp.ne.s32.totalorder %s91_s30, %s978_s20  ;;  %p984_p3 = scmp.lt.s32.totalorder %s978_s20, %s978_s20 }
  0x60   :  { %p985_p4 = por %p984_p3, %p983_p2 }
  0x62   :  { %p986_p5 = pnand %p985_p4, %p979_p1 }
  0x64   :  { %989 = shalt.err (!%p986_p5)
}
  0x65   :  { %96 = dma.hbm_to_vmem [thread:$0]  %s1262_s7, 1024, %s91_s30, [#allocation12], %s1027_s18, %s1027_s18, %s1028_s24  }
  0x66   :  { %1012 = dma.done.wait [#allocation3], 128  }
  0x67   :  { %1013 = vsyncadd [#allocation3], 4294967168 }
  0x68   :  { %1014 = dma.done.wait [#allocation6], 1280  }
  0x69   :  { %1015 = vsyncadd [#allocation6], 4294966016 }
  0x6a   :  { %1016 = dma.done.wait [#allocation9], 2048  }
  0x6b   :  { %1017 = vsyncadd [#allocation9], 4294965248 }
  0x6c   :  { %1018 = dma.done.wait [#allocation12], 1024  }
  0x6d   :  { %1019 = vsyncadd [#allocation12], 4294966272  ;;  %v1032_v0 = vmov 0.0   ;;  %vm1033_vm0 = vmmov 0   ;;  %v821_v1 = vld [vmem:[#allocation7] sm:$0xff]   ;;  %v822_v2 = vld [vmem:[#allocation7 + $0x8] sm:$0xff]  }
  0x6e   :  { %728 = vmatprep.subr.bf16.mxu0 %v1032_v0  ;;  %744 = vmatprep.mubr.msk.bf16.mxu0 %vm1033_vm0, %v1032_v0  ;;  %v823_v3 = vld [vmem:[#allocation7 + $0x10] sm:$0xff]   ;;  %v830_v4 = vld [vmem:[#allocation8] sm:$0xff]   ;;  %v824_v5 = vld [vmem:[#allocation7 + $0x18] sm:$0xff]   ;;  %s1034_s25 = smov [#allocation13]  }
  0x6f   :  { %748 = vmatprep.subr.bf16.mxu1 %v1032_v0  ;;  %764 = vmatprep.mubr.msk.bf16.mxu1 %vm1033_vm0, %v1032_v0  ;;  %v831_v6 = vld [vmem:[#allocation8 + $0x8] sm:$0xff]   ;;  %v825_v7 = vld [vmem:[#allocation7 + $0x20] sm:$0xff]   ;;  %v832_v8 = vld [vmem:[#allocation8 + $0x10] sm:$0xff]   ;;  %s639_s26 = sshll.u32 %s1034_s25, 4  ;;  %s640_s26 = int_to_ptr.vmem [resolvable:$true] %s639_s26 }
  0x70   :  { %729 = vmatpush3.bf16.msra.mxu0 %v821_v1  ;;  %749 = vmatpush3.bf16.msra.mxu1 %v830_v4  ;;  %v826_v9 = vld [vmem:[#allocation7 + $0x28] sm:$0xff]   ;;  %v833_v10 = vld [vmem:[#allocation8 + $0x18] sm:$0xff]   ;;  %v827_v11 = vld [vmem:[#allocation7 + $0x30] sm:$0xff]   ;;  %p995_p7 = scmp.lt.s32.totalorder %s640_s26, %s640_s26 }
  0x71   :  { %730 = vmatprep.subr.bf16.mxu0 %v1032_v0  ;;  %750 = vmatprep.subr.bf16.mxu1 %v1032_v0  ;;  %v834_v12 = vld [vmem:[#allocation8 + $0x20] sm:$0xff]   ;;  %v828_v13 = vld [vmem:[#allocation7 + $0x38] sm:$0xff]   ;;  %v835_v14 = vld [vmem:[#allocation8 + $0x28] sm:$0xff]  }
  0x72   :  { %v829_v15 = vld [vmem:[#allocation2] sm:$0xff]   ;;  %v836_v16 = vld [vmem:[#allocation8 + $0x30] sm:$0xff]   ;;  %v837_v17 = vld [vmem:[#allocation8 + $0x38] sm:$0xff]  }
  0x73   :  { %v838_v18 = vld [vmem:[#allocation10] sm:$0xff]   ;;  %v839_v19 = vld [vmem:[#allocation10 + $0x8] sm:$0xff]   ;;  %v840_v20 = vld [vmem:[#allocation10 + $0x10] sm:$0xff]  }
  0x74   :  { %731 = vmatpush3.bf16.msra.mxu0 %v822_v2  ;;  %751 = vmatpush3.bf16.msra.mxu1 %v831_v6  ;;  %v841_v21 = vld [vmem:[#allocation10 + $0x18] sm:$0xff]   ;;  %v842_v22 = vld [vmem:[#allocation10 + $0x20] sm:$0xff]   ;;  %v843_v23 = vld [vmem:[#allocation10 + $0x28] sm:$0xff]  }
  0x75   :  { %732 = vmatprep.subr.bf16.mxu0 %v1032_v0  ;;  %752 = vmatprep.subr.bf16.mxu1 %v1032_v0  ;;  %v654_v24 = vld [vmem:[%s1258_s3] ss:$0 sm:$0xff]  ;;  %v844_v32 = vld [vmem:[#allocation10 + $0x30] sm:$0xff]   ;;  %v845_v33 = vld [vmem:[#allocation10 + $0x38] sm:$0xff]  }
  0x76   :  { %v846_v34 = vld [vmem:[#allocation11] sm:$0xff]   ;;  %v847_v35 = vld [vmem:[#allocation11 + $0x8] sm:$0xff]   ;;  %v848_v36 = vld [vmem:[#allocation11 + $0x10] sm:$0xff]  }
  0x77   :  { %v849_v37 = vld [vmem:[#allocation11 + $0x18] sm:$0xff]   ;;  %v850_v38 = vld [vmem:[#allocation11 + $0x20] sm:$0xff]   ;;  %v851_v39 = vld [vmem:[#allocation11 + $0x28] sm:$0xff]  }
  0x78   :  { %733 = vmatpush3.bf16.msra.mxu0 %v823_v3  ;;  %753 = vmatpush3.bf16.msra.mxu1 %v832_v8  ;;  %v664_v40 = vld [vmem:[%s1260_s5] ss:$0 sm:$0xff]  ;;  %v852_v48 = vld [vmem:[#allocation11 + $0x30] sm:$0xff]   ;;  %v853_v49 = vld [vmem:[#allocation11 + $0x38] sm:$0xff]  }
  0x79   :  { %734 = vmatprep.subr.bf16.mxu0 %v1032_v0  ;;  %754 = vmatprep.subr.bf16.mxu1 %v1032_v0  ;;  %v681_v59 = vld [vmem:[%s1263_s8] ss:$0 sm:$0xff]  ;;  %v581_v4 = vld [vmem:[#allocation5 + $0x8] sm:$0xff] }
  0x7c   :  { %735 = vmatpush3.bf16.msra.mxu0 %v824_v5  ;;  %755 = vmatpush3.bf16.msra.mxu1 %v833_v10 }
  0x7d   :  { %736 = vmatprep.subr.bf16.mxu0 %v1032_v0  ;;  %756 = vmatprep.subr.bf16.mxu1 %v1032_v0 }
  0x80   :  { %737 = vmatpush3.bf16.msra.mxu0 %v825_v7  ;;  %757 = vmatpush3.bf16.msra.mxu1 %v834_v12 }
  0x81   :  { %738 = vmatprep.subr.bf16.mxu0 %v1032_v0  ;;  %758 = vmatprep.subr.bf16.mxu1 %v1032_v0 }
  0x84   :  { %739 = vmatpush3.bf16.msra.mxu0 %v826_v9  ;;  %759 = vmatpush3.bf16.msra.mxu1 %v835_v14 }
  0x85   :  { %740 = vmatprep.subr.bf16.mxu0 %v1032_v0  ;;  %760 = vmatprep.subr.bf16.mxu1 %v1032_v0 }
  0x88   :  { %741 = vmatpush3.bf16.msra.mxu0 %v827_v11  ;;  %761 = vmatpush3.bf16.msra.mxu1 %v836_v16 }
  0x89   :  { %742 = vmatprep.subr.bf16.mxu0 %v1032_v0  ;;  %762 = vmatprep.subr.bf16.mxu1 %v1032_v0 }
  0x8c   :  { %743 = vmatpush3.bf16.msra.mxu0 %v828_v13  ;;  %763 = vmatpush3.bf16.msra.mxu1 %v837_v17 }
  0x8d   :  { %768 = vmatprep.subr.bf16.mxu0 %v1032_v0  ;;  %788 = vmatprep.subr.bf16.mxu1 %v1032_v0 }
  0x8f   :  { %745 = vmatmul.mubr.bf16.vlgmr.msra.gmra.mrb[0].mxu0 %v829_v15 }
  0x90   :  { %784 = vmatprep.mubr.msk.bf16.mxu0 %vm1033_vm0, %v1032_v0  ;;  %769 = vmatpush3.bf16.msra.mxu0 %v838_v18 }
  0x91   :  { %770 = vmatprep.subr.bf16.mxu0 %v1032_v0 }
  0x94   :  { %771 = vmatpush3.bf16.msra.mxu0 %v839_v19 }
  0x95   :  { %772 = vmatprep.subr.bf16.mxu0 %v1032_v0 }
  0x98   :  { %773 = vmatpush3.bf16.msra.mxu0 %v840_v20 }
  0x99   :  { %774 = vmatprep.subr.bf16.mxu0 %v1032_v0 }
  0x9c   :  { %775 = vmatpush3.bf16.msra.mxu0 %v841_v21 }
  0x9d   :  { %776 = vmatprep.subr.bf16.mxu0 %v1032_v0 }
  0xa0   :  { %777 = vmatpush3.bf16.msra.mxu0 %v842_v22 }
  0xa1   :  { %778 = vmatprep.subr.bf16.mxu0 %v1032_v0 }
  0xa4   :  { %779 = vmatpush3.bf16.msra.mxu0 %v843_v23 }
  0xa5   :  { %780 = vmatprep.subr.bf16.mxu0 %v1032_v0 }
  0xa8   :  { %781 = vmatpush3.bf16.msra.mxu0 %v844_v32 }
  0xa9   :  { %782 = vmatprep.subr.bf16.mxu0 %v1032_v0 }
  0xac   :  { %783 = vmatpush3.bf16.msra.mxu0 %v845_v33 }
 0x162   :  { %v235_v25 = vpop.f32.mrb[0].mxu0 }
 0x163   :  { %v746_v26 = vpop.f32.mrb[1].mxu0  ;;  %v236_v28 = vadd.f32 %v654_v24, %v235_v25 }
 0x164   :  { %v238_v27 = vpop.f32.mrb[2].mxu0  ;;  %v690_v26 = vld [vmem:[%s1264_s9] ss:$0 sm:$0xff]  ;;  %s990_s9 = scalar_lea.vmem %s640_s26, 256 }
 0x165   :  { %v239_v29 = vadd.f32 %v654_v24, %v238_v27  ;;  %v747_v30 = vpop.f32.mrb[3].mxu0  ;;  %p991_p6 = scmp.ne.s32.totalorder %s640_s26, %s990_s9  ;;  %p996_p8 = scmp.lt.s32.totalorder %s990_s9, %s990_s9 }
 0x167   :  { %v242_v31 = vpack.c.bf16 %v239_v29, %v236_v28  ;;  %p997_p9 = por %p996_p8, %p995_p7 }
 0x169   :  { %765 = vmatmul.mubr.bf16.vlgmr.msra.gmra.mrb[0].mxu1 %v242_v31  ;;  %p998_p10 = pnand %p997_p9, %p991_p6 }
 0x16a   :  { %804 = vmatprep.mubr.msk.bf16.mxu1 %vm1033_vm0, %v1032_v0  ;;  %789 = vmatpush3.bf16.msra.mxu1 %v846_v34 }
 0x16b   :  { %790 = vmatprep.subr.bf16.mxu1 %v1032_v0 }
 0x16e   :  { %791 = vmatpush3.bf16.msra.mxu1 %v847_v35 }
 0x16f   :  { %792 = vmatprep.subr.bf16.mxu1 %v1032_v0 }
 0x172   :  { %793 = vmatpush3.bf16.msra.mxu1 %v848_v36 }
 0x173   :  { %794 = vmatprep.subr.bf16.mxu1 %v1032_v0 }
 0x176   :  { %795 = vmatpush3.bf16.msra.mxu1 %v849_v37 }
 0x177   :  { %796 = vmatprep.subr.bf16.mxu1 %v1032_v0 }
 0x17a   :  { %797 = vmatpush3.bf16.msra.mxu1 %v850_v38 }
 0x17b   :  { %798 = vmatprep.subr.bf16.mxu1 %v1032_v0 }
 0x17e   :  { %799 = vmatpush3.bf16.msra.mxu1 %v851_v39 }
 0x17f   :  { %800 = vmatprep.subr.bf16.mxu1 %v1032_v0 }
 0x182   :  { %801 = vmatpush3.bf16.msra.mxu1 %v852_v48 }
 0x183   :  { %802 = vmatprep.subr.bf16.mxu1 %v1032_v0  ;;  %v580_v0 = vld [vmem:[#allocation5] sm:$0xff] }
 0x186   :  { %803 = vmatpush3.bf16.msra.mxu1 %v853_v49 }
 0x23c   :  { %v348_v41 = vpop.f32.mrb[0].mxu1 }
 0x23d   :  { %v766_v42 = vpop.f32.mrb[1].mxu1  ;;  %v349_v44 = vadd.f32 %v664_v40, %v348_v41 }
 0x23e   :  { %v351_v43 = vpop.f32.mrb[2].mxu1 }
 0x23f   :  { %v352_v45 = vadd.f32 %v664_v40, %v351_v43  ;;  %v767_v46 = vpop.f32.mrb[3].mxu1 }
 0x241   :  { %v355_v47 = vpack.c.bf16 %v352_v45, %v349_v44 }
 0x243   :  { %785 = vmatmul.mubr.bf16.vlgmr.msra.gmra.mrb[4].mxu0 %v355_v47 }
 0x316   :  { %v454_v50 = vpop.f32.mrb[4].mxu0 }
 0x317   :  { %v461_v51 = vmax.f32 %v454_v50, 0.0  ;;  %v786_v52 = vpop.f32.mrb[5].mxu0 }
 0x318   :  { %v457_v53 = vpop.f32.mrb[6].mxu0 }
 0x319   :  { %v462_v54 = vmax.f32 %v457_v53, 0.0  ;;  %v787_v55 = vpop.f32.mrb[7].mxu0  ;;  %v463_v56 = vmul.f32 0.25, %v461_v51 }
 0x31b   :  { %v464_v57 = vmul.f32 0.25, %v462_v54 }
 0x31d   :  { %v465_v58 = vpack.c.bf16 %v464_v57, %v463_v56 }
 0x31f   :  { %805 = vmatmul.mubr.bf16.vlgmr.msra.gmra.mrb[4].mxu1 %v465_v58 }
 0x3f2   :  { %v571_v60 = vpop.f32.mrb[4].mxu1 }
 0x3f3   :  { %v572_v61 = vadd.f32 %v681_v59, %v571_v60  ;;  %v806_v62 = vpop.f32.mrb[5].mxu1 }
 0x3f4   :  { %v574_v63 = vpop.f32.mrb[6].mxu1 }
 0x3f5   :  { %v578_v1 = vadd.f32 %v572_v61, %v236_v28  ;;  %v575_v2 = vadd.f32 %v681_v59, %v574_v63  ;;  %v807_v3 = vpop.f32.mrb[7].mxu1 }
 0x3f7   :  { %v579_v5 = vadd.f32 %v575_v2, %v239_v29  ;;  %v582_v6 = vadd.f32 %v580_v0, %v578_v1  ;;  %v691_v29 = vld [vmem:[%s1265_s10] ss:$0 sm:$0xff] }
 0x3f9   :  { %584 = vadd.xlane.f32.xlu0 %v582_v6  ;;  %v590_v7 = vmul.f32 %v582_v6, %v582_v6  ;;  %v583_v8 = vadd.f32 %v581_v4, %v579_v5 }
 0x3fb   :  { %592 = vadd.xlane.f32.xlu1 %v590_v7  ;;  %v591_v9 = vmul.f32 %v583_v8, %v583_v8 }
 0x3fd   :  { %586 = vadd.xlane.f32.xlu0 %v583_v8 }
 0x3ff   :  { %594 = vadd.xlane.f32.xlu1 %v591_v9 }
 0x486   :  { %v585_v10 = vpop.xlane.xlu0 %584 }
 0x487   :  { %v588_v11 = vmul.f32 0.03125, %v585_v10 }
 0x488   :  { %v593_v12 = vpop.xlane.xlu1 %592 }
 0x489   :  { %v598_v13 = vmul.f32 %v588_v11, %v588_v11  ;;  %v596_v14 = vmul.f32 0.03125, %v593_v12 }
 0x48a   :  { %v587_v15 = vpop.xlane.xlu0 %586 }
 0x48b   :  { %v600_v16 = vsub.f32 %v596_v14, %v598_v13  ;;  %v589_v17 = vmul.f32 0.03125, %v587_v15 }
 0x48c   :  { %v595_v18 = vpop.xlane.xlu1 %594 }
 0x48d   :  { %v602_v19 = vmax.f32 %v600_v16, 0.0  ;;  %v599_v20 = vmul.f32 %v589_v17, %v589_v17  ;;  %v597_v21 = vmul.f32 0.03125, %v595_v18 }
 0x48f   :  { %v605_v22 = vadd.f32 1e-12, %v602_v19  ;;  %v601_v23 = vsub.f32 %v597_v21, %v599_v20 }
 0x491   :  { %854 = vrsqrt.f32 %v605_v22  ;;  %v603_v24 = vmax.f32 %v601_v23, 0.0 }
 0x493   :  { %v606_v25 = vadd.f32 1e-12, %v603_v24 }
 0x495   :  { %856 = vrsqrt.f32 %v606_v25 }
 0x49b   :  { %v855_v27 = vpop.eup %854 }
 0x49c   :  { %v615_v28 = vmul.f32 %v855_v27, %v690_v26 }
 0x49e   :  { %v618_v30 = vmul.f32 %v615_v28, %v588_v11  ;;  %v628_v34 = vmul.f32 %v615_v28, %v582_v6 }
 0x49f   :  { %v857_v31 = vpop.eup %856 }
 0x4a0   :  { %v616_v32 = vmul.f32 %v857_v31, %v690_v26  ;;  %v626_v33 = vsub.f32 %v691_v29, %v618_v30 }
 0x4a2   :  { %v619_v35 = vmul.f32 %v616_v32, %v589_v17  ;;  %v630_v36 = vadd.f32 %v628_v34, %v626_v33  ;;  %v629_v38 = vmul.f32 %v616_v32, %v583_v8 }
 0x4a4   :  { %v627_v37 = vsub.f32 %v691_v29, %v619_v35  ;;  %632 = vst [vmem:[#allocation13] sm:$0xff] %v630_v36 }
 0x4a6   :  { %v631_v39 = vadd.f32 %v629_v38, %v627_v37 }
 0x4a8   :  { %633 = vst [vmem:[#allocation13 + $0x8] sm:$0xff] %v631_v39 }
 0x4a9   :  { %1001 = shalt.err (!%p998_p10)
}
 0x4aa   :  { %s1002_s22 = scalar_lea.hbm %s1266_s11, 256 }
 0x4ab   :  { %p1003_p11 = scmp.ne.s32.totalorder %s1266_s11, %s1002_s22  ;;  %p1006_p12 = scmp.lt.u32.totalorder %s1002_s22, %s1266_s11 }
 0x4ad   :  { %p1008_p13 = pnand %p1006_p12, %p1003_p11 }
 0x4af   :  { %1011 = shalt.err (!%p1008_p13)
}
 0x4b0   :  { %645 = dma.vmem_to_hbm [thread:$0]  %s640_s26, 256, %s1266_s11, [#allocation4], %s1023_s27, %s1023_s27, %s1024_s28  }
 0x4b1   :  { %1020 = dma.done.wait [#allocation4], 256  }
 0x4b2   :  { %1021 = vsyncadd [#allocation4], 4294967040 }
 0x4b3   :  { %649 = vsyncpa [#allocation3], 1 }
 0x4b4   :  { %650 = vsyncpa [#allocation6], 1 }
 0x4b5   :  { %651 = vsyncpa [#allocation9], 1 }
 0x4b6   :  { %652 = vsyncpa [#allocation12], 1 }
 0x4b7   :  { %653 = vsyncpa [#allocation4], 1 }

</bundles_post_ra>
